<compile_context>
chip_gen: v7x
topology: tpu7x:2x2x1
jax: 0.10.0
libtpu: 0.0.40
codegen_flags: <defaults>
</compile_context>

<pallas_src>
import functools

import jax
import jax.numpy as jnp
import numpy as np
from jax import lax
from jax.experimental import pallas as pl
from jax.experimental.pallas import tpu as pltpu

SM_C = 1e-6        # self.sm_c
HEAD_LANES = 128   # packed head width: [mean | std | logits | zero padding]
TILE_B = 128       # batch tile (rows) for large batches


def _round_up(x, m):
    return (x + m - 1) // m * m


def _actor_kernel(n_action, n_action_type,
                  x_ref, w1_ref, b1_ref, w2_ref, b2_ref, wh_ref, bh_ref,
                  out_ref):
    x = x_ref[...]                                              # (TB, D) f32

    # fc: Linear -> ReLU -> Linear -> ReLU.
    # bf16 MXU inputs, f32 accumulation; element-wise math stays f32.
    h1 = jnp.dot(x.astype(jnp.bfloat16), w1_ref[...],
                 preferred_element_type=jnp.float32) + b1_ref[...]
    h1 = jnp.maximum(h1, 0.0)
    h2 = jnp.dot(h1.astype(jnp.bfloat16), w2_ref[...],
                 preferred_element_type=jnp.float32) + b2_ref[...]
    h2 = jnp.maximum(h2, 0.0)

    # Fused heads: one lane-dense matmul.
    # lanes [0:NA)=mean, [NA:2NA)=std logits, [2NA:2NA+NT)=action-type logits.
    head = jnp.dot(h2.astype(jnp.bfloat16), wh_ref[...],
                   preferred_element_type=jnp.float32) + bh_ref[...]

    lane = lax.broadcasted_iota(jnp.int32, head.shape, 1)
    mean_m = lane < n_action
    std_m = (lane >= n_action) & (lane < 2 * n_action)
    logit_m = (lane >= 2 * n_action) & (lane < 2 * n_action + n_action_type)

    # Masked softmax over the action-type lanes (full lane-width VPU/EUP ops).
    masked_logits = jnp.where(logit_m, head, -1e30)
    mx = jnp.max(masked_logits, axis=-1, keepdims=True)
    e = jnp.exp(masked_logits - mx)            # masked-off lanes -> exactly 0
    s = jnp.sum(e, axis=-1, keepdims=True)
    probs = e * pl.reciprocal(s, approx=True)

    out = jnp.where(mean_m, head, 0.0)
    out = jnp.where(std_m, jnp.clip(head, SM_C, 1.0), out)
    out = jnp.where(logit_m, probs, out)
    out_ref[...] = out                     # single unmasked lane-dense store


@functools.partial(jax.jit, static_argnames=("n_action", "n_action_type"))
def actor_forward(state, packed, *, n_action=4, n_action_type=3):
    """state: [B, input_dim] f32. packed: kernel-ready params (pack_actor_params)."""
    B, D = state.shape
    H1 = packed["w1"].shape[1]
    H2 = packed["w2"].shape[1]

    # Batch tiling: pad B to a sublane multiple; 128-row tiles for large B.
    B_pad = max(8, _round_up(B, 8))
    if B_pad > TILE_B:
        B_pad = _round_up(B_pad, TILE_B)
        tb = TILE_B
    else:
        tb = B_pad
    if B_pad != B:
        state = jnp.pad(state, ((0, B_pad - B), (0, 0)))
    nb = B_pad // tb

    kernel = functools.partial(_actor_kernel, n_action, n_action_type)

    flops = 2 * B_pad * (D * H1 + H1 * H2 + H2 * HEAD_LANES)
    bytes_accessed = (
        B_pad * D * 4                                             # state in
        + (packed["w1"].size + packed["w2"].size + packed["wh"].size) * 2
        + (packed["b1"].size + packed["b2"].size + packed["bh"].size) * 4
        + B_pad * HEAD_LANES * 4                                  # packed out
    )

    out = pl.pallas_call(
        kernel,
        out_shape=jax.ShapeDtypeStruct((B_pad, HEAD_LANES), jnp.float32),
        grid=(nb,),
        in_specs=[
            pl.BlockSpec((tb, D), lambda i: (i, 0)),          # state: batch-tiled
            pl.BlockSpec((D, H1), lambda i: (0, 0)),          # weights: VMEM-resident
            pl.BlockSpec((1, H1), lambda i: (0, 0)),
            pl.BlockSpec((H1, H2), lambda i: (0, 0)),
            pl.BlockSpec((1, H2), lambda i: (0, 0)),
            pl.BlockSpec((H2, HEAD_LANES), lambda i: (0, 0)),
            pl.BlockSpec((1, HEAD_LANES), lambda i: (0, 0)),
        ],
        out_specs=pl.BlockSpec((tb, HEAD_LANES), lambda i: (i, 0)),
        compiler_params=pltpu.CompilerParams(
            dimension_semantics=("parallel",)),
        cost_estimate=pl.CostEstimate(
            flops=flops,
            transcendentals=B_pad * (HEAD_LANES + 1),
            bytes_accessed=bytes_accessed),
    )(state, packed["w1"], packed["b1"], packed["w2"], packed["b2"],
      packed["wh"], packed["bh"])

    mean = out[:B, :n_action]
    std = out[:B, n_action:2 * n_action]
    probs = out[:B, 2 * n_action:2 * n_action + n_action_type]
    return mean, std, probs


def init_actor_params(key, input_dim=128, fcl_dims=(256, 256), n_action=4,
                      n_action_type=3):
    """Deterministic synthetic init (PyTorch-like uniform fan-in scaling)."""
    def linear(k, fan_in, fan_out):
        kw, kb = jax.random.split(k)
        bound = 1.0 / np.sqrt(fan_in)
        w = jax.random.uniform(kw, (fan_in, fan_out), jnp.float32, -bound, bound)
        b = jax.random.uniform(kb, (1, fan_out), jnp.float32, -bound, bound)
        return w, b

    keys = jax.random.split(key, 5)
    w1, b1 = linear(keys[0], input_dim, fcl_dims[0])
    w2, b2 = linear(keys[1], fcl_dims[0], fcl_dims[1])
    wm, bm = linear(keys[2], fcl_dims[1], n_action)
    ws, bs = linear(keys[3], fcl_dims[1], n_action)
    wt, bt = linear(keys[4], fcl_dims[1], n_action_type)
    return dict(w1=w1, b1=b1, w2=w2, b2=b2, wm=wm, bm=bm,
                ws=ws, bs=bs, wt=wt, bt=bt)


def pack_actor_params(p):
    """Kernel-ready params: bf16 weights, heads fused and lane-padded to 128."""
    wh = jnp.concatenate([p["wm"], p["ws"], p["wt"]], axis=1)
    bh = jnp.concatenate([p["bm"], p["bs"], p["bt"]], axis=1)
    pad = HEAD_LANES - wh.shape[1]
    wh = jnp.pad(wh, ((0, 0), (0, pad)))
    bh = jnp.pad(bh, ((0, 0), (0, pad)))
    return dict(
        w1=p["w1"].astype(jnp.bfloat16), b1=p["b1"],
        w2=p["w2"].astype(jnp.bfloat16), b2=p["b2"],
        wh=wh.astype(jnp.bfloat16), bh=bh,
    )


def _reference_forward(state, p):
    """Pure-JAX reference mirroring the kernel's bf16 matmul inputs."""
    def mm(x, w):
        return jnp.dot(x.astype(jnp.bfloat16), w.astype(jnp.bfloat16),
                       preferred_element_type=jnp.float32)

    h1 = jnp.maximum(mm(state, p["w1"]) + p["b1"], 0.0)
    h2 = jnp.maximum(mm(h1, p["w2"]) + p["b2"], 0.0)
    mean = mm(h2, p["wm"]) + p["bm"]
    std = jnp.clip(mm(h2, p["ws"]) + p["bs"], SM_C, 1.0)
    probs = jax.nn.softmax(mm(h2, p["wt"]) + p["bt"], axis=-1)
    return mean, std, probs


if __name__ == "__main__":
    key = jax.random.PRNGKey(0)
    k_state, k_params = jax.random.split(key)

    B, INPUT_DIM = 8, 128  # input_dims=[128]
    N_ACTION, N_ACTION_TYPE = 4, 3
    state = jax.random.normal(k_state, (B, INPUT_DIM), dtype=jnp.float32)
    params = init_actor_params(k_params, input_dim=INPUT_DIM,
                               fcl_dims=(256, 256), n_action=N_ACTION,
                               n_action_type=N_ACTION_TYPE)
    packed = pack_actor_params(params)

    mean, std, probs = actor_forward(state, packed,
                                     n_action=N_ACTION,
                                     n_action_type=N_ACTION_TYPE)
    jax.block_until_ready((mean, std, probs))

    # Sanity-check against a pure-JAX reference (same bf16 weight rounding;
    # tolerance covers MXU accumulation order + approx reciprocal in softmax).
    ref_mean, ref_std, ref_probs = _reference_forward(state, params)
    np.testing.assert_allclose(np.asarray(mean), np.asarray(ref_mean),
                               atol=2e-3, rtol=2e-3)
    np.testing.assert_allclose(np.asarray(std), np.asarray(ref_std),
                               atol=2e-3, rtol=2e-3)
    np.testing.assert_allclose(np.asarray(probs), np.asarray(ref_probs),
                               atol=2e-3, rtol=2e-3)

    # TODO(synk): get_actions / compute_log_prob (Normal/Categorical sampling),
    # optimizer and checkpoint I/O are host-side and not part of forward().
    print("KERNEL_OK")
</pallas_src>

<mosaic_0001>
module attributes {stable_mosaic.version = 11 : i64} {
  func.func @_actor_kernel(%arg0: i32, %arg1: memref<8x128xf32, #tpu.memory_space<vmem>>, %arg2: memref<128x256xbf16, #tpu.memory_space<vmem>>, %arg3: memref<1x256xf32, #tpu.memory_space<vmem>>, %arg4: memref<256x256xbf16, #tpu.memory_space<vmem>>, %arg5: memref<1x256xf32, #tpu.memory_space<vmem>>, %arg6: memref<256x128xbf16, #tpu.memory_space<vmem>>, %arg7: memref<1x128xf32, #tpu.memory_space<vmem>>, %arg8: memref<8x128xf32, #tpu.memory_space<vmem>>) attributes {dimension_semantics = [#tpu.dimension_semantics<parallel>], iteration_bounds = array<i64: 1>, scalar_prefetch = 0 : i64, scratch_operands = 0 : i64, tpu.core_type = #tpu.core_type<tc>, window_params = [{transform_indices = @transform_0, window_bounds = array<i64: 8, 128>}, {pipeline_mode = #tpu.pipeline_mode<synchronous>, transform_indices = @transform_1, window_bounds = array<i64: 128, 256>}, {pipeline_mode = #tpu.pipeline_mode<synchronous>, transform_indices = @transform_2, window_bounds = array<i64: 1, 256>}, {pipeline_mode = #tpu.pipeline_mode<synchronous>, transform_indices = @transform_3, window_bounds = array<i64: 256, 256>}, {pipeline_mode = #tpu.pipeline_mode<synchronous>, transform_indices = @transform_4, window_bounds = array<i64: 1, 256>}, {pipeline_mode = #tpu.pipeline_mode<synchronous>, transform_indices = @transform_5, window_bounds = array<i64: 256, 128>}, {pipeline_mode = #tpu.pipeline_mode<synchronous>, transform_indices = @transform_6, window_bounds = array<i64: 1, 128>}, {transform_indices = @transform_7, window_bounds = array<i64: 8, 128>}]} {
    %c0 = arith.constant 0 : index
    %c0_0 = arith.constant 0 : index
    %0 = vector.load %arg1[%c0, %c0_0] : memref<8x128xf32, #tpu.memory_space<vmem>>, vector<8x128xf32>
    %1 = arith.truncf %0 : vector<8x128xf32> to vector<8x128xbf16>
    %c0_1 = arith.constant 0 : index
    %c0_2 = arith.constant 0 : index
    %2 = vector.load %arg2[%c0_1, %c0_2] : memref<128x256xbf16, #tpu.memory_space<vmem>>, vector<128x256xbf16>
    %cst = arith.constant dense<0.000000e+00> : vector<8x256xf32>
    %3 = tpu.matmul %1, %2, %cst {dimension_numbers = #tpu.dot_dimension_numbers<[1], [0], [0], [1], [0, 0, 1, 1], [], []>} : vector<8x128xbf16>, vector<128x256xbf16>, vector<8x256xf32> -> vector<8x256xf32>
    %c0_3 = arith.constant 0 : index
    %c0_4 = arith.constant 0 : index
    %4 = vector.load %arg3[%c0_3, %c0_4] : memref<1x256xf32, #tpu.memory_space<vmem>>, vector<1x256xf32>
    %5 = vector.broadcast %4 : vector<1x256xf32> to vector<8x256xf32>
    %6 = arith.addf %3, %5 : vector<8x256xf32>
    %cst_5 = arith.constant 0.000000e+00 : f32
    %7 = vector.broadcast %cst_5 : f32 to vector<8x256xf32>
    %8 = arith.maximumf %6, %7 : vector<8x256xf32>
    %9 = arith.truncf %8 : vector<8x256xf32> to vector<8x256xbf16>
    %c0_6 = arith.constant 0 : index
    %c0_7 = arith.constant 0 : index
    %10 = vector.load %arg4[%c0_6, %c0_7] : memref<256x256xbf16, #tpu.memory_space<vmem>>, vector<256x256xbf16>
    %cst_8 = arith.constant dense<0.000000e+00> : vector<8x256xf32>
    %11 = tpu.matmul %9, %10, %cst_8 {dimension_numbers = #tpu.dot_dimension_numbers<[1], [0], [0], [1], [0, 0, 1, 1], [], []>} : vector<8x256xbf16>, vector<256x256xbf16>, vector<8x256xf32> -> vector<8x256xf32>
    %c0_9 = arith.constant 0 : index
    %c0_10 = arith.constant 0 : index
    %12 = vector.load %arg5[%c0_9, %c0_10] : memref<1x256xf32, #tpu.memory_space<vmem>>, vector<1x256xf32>
    %13 = vector.broadcast %12 : vector<1x256xf32> to vector<8x256xf32>
    %14 = arith.addf %11, %13 : vector<8x256xf32>
    %cst_11 = arith.constant 0.000000e+00 : f32
    %15 = vector.broadcast %cst_11 : f32 to vector<8x256xf32>
    %16 = arith.maximumf %14, %15 : vector<8x256xf32>
    %17 = arith.truncf %16 : vector<8x256xf32> to vector<8x256xbf16>
    %c0_12 = arith.constant 0 : index
    %c0_13 = arith.constant 0 : index
    %18 = vector.load %arg6[%c0_12, %c0_13] : memref<256x128xbf16, #tpu.memory_space<vmem>>, vector<256x128xbf16>
    %cst_14 = arith.constant dense<0.000000e+00> : vector<8x128xf32>
    %19 = tpu.matmul %17, %18, %cst_14 {dimension_numbers = #tpu.dot_dimension_numbers<[1], [0], [0], [1], [0, 0, 1, 1], [], []>} : vector<8x256xbf16>, vector<256x128xbf16>, vector<8x128xf32> -> vector<8x128xf32>
    %c0_15 = arith.constant 0 : index
    %c0_16 = arith.constant 0 : index
    %20 = vector.load %arg7[%c0_15, %c0_16] : memref<1x128xf32, #tpu.memory_space<vmem>>, vector<1x128xf32>
    %21 = vector.broadcast %20 : vector<1x128xf32> to vector<8x128xf32>
    %22 = arith.addf %19, %21 : vector<8x128xf32>
    %23 = tpu.iota {dimensions = array<i32: 1>} : vector<8x128xi32>
    %c4_i32 = arith.constant 4 : i32
    %24 = vector.broadcast %c4_i32 : i32 to vector<8x128xi32>
    %25 = arith.cmpi slt, %23, %24 : vector<8x128xi32>
    %c4_i32_17 = arith.constant 4 : i32
    %26 = vector.broadcast %c4_i32_17 : i32 to vector<8x128xi32>
    %27 = arith.cmpi sge, %23, %26 : vector<8x128xi32>
    %c8_i32 = arith.constant 8 : i32
    %28 = vector.broadcast %c8_i32 : i32 to vector<8x128xi32>
    %29 = arith.cmpi slt, %23, %28 : vector<8x128xi32>
    %30 = arith.andi %27, %29 : vector<8x128xi1>
    %c8_i32_18 = arith.constant 8 : i32
    %31 = vector.broadcast %c8_i32_18 : i32 to vector<8x128xi32>
    %32 = arith.cmpi sge, %23, %31 : vector<8x128xi32>
    %c11_i32 = arith.constant 11 : i32
    %33 = vector.broadcast %c11_i32 : i32 to vector<8x128xi32>
    %34 = arith.cmpi slt, %23, %33 : vector<8x128xi32>
    %35 = arith.andi %32, %34 : vector<8x128xi1>
    %cst_19 = arith.constant -1.000000e+30 : f32
    %36 = vector.broadcast %cst_19 : f32 to vector<8x128xf32>
    %37 = arith.select %35, %22, %36 : vector<8x128xi1>, vector<8x128xf32>
    %cst_20 = arith.constant dense<0xFF800000> : vector<8xf32>
    %38 = vector.multi_reduction <maximumf>, %37, %cst_20 [1] : vector<8x128xf32> to vector<8xf32>
    %39 = vector.shape_cast %38 : vector<8xf32> to vector<8x1xf32>
    %40 = vector.broadcast %39 : vector<8x1xf32> to vector<8x128xf32>
    %41 = arith.subf %37, %40 : vector<8x128xf32>
    %42 = math.exp %41 : vector<8x128xf32>
    %cst_21 = arith.constant dense<0.000000e+00> : vector<8xf32>
    %43 = vector.multi_reduction <add>, %42, %cst_21 [1] : vector<8x128xf32> to vector<8xf32>
    %44 = vector.shape_cast %43 : vector<8xf32> to vector<8x1xf32>
    %45 = tpu.reciprocal %44 {approx = true} : vector<8x1xf32> -> vector<8x1xf32>
    %46 = vector.broadcast %45 : vector<8x1xf32> to vector<8x128xf32>
    %47 = arith.mulf %42, %46 : vector<8x128xf32>
    %cst_22 = arith.constant 0.000000e+00 : f32
    %48 = vector.broadcast %cst_22 : f32 to vector<8x128xf32>
    %49 = arith.select %25, %22, %48 : vector<8x128xi1>, vector<8x128xf32>
    %cst_23 = arith.constant 9.99999997E-7 : f32
    %cst_24 = arith.constant 1.000000e+00 : f32
    %50 = vector.broadcast %cst_23 : f32 to vector<8x128xf32>
    %51 = arith.maximumf %50, %22 : vector<8x128xf32>
    %52 = vector.broadcast %cst_24 : f32 to vector<8x128xf32>
    %53 = arith.minimumf %52, %51 : vector<8x128xf32>
    %54 = arith.select %30, %53, %49 : vector<8x128xi1>, vector<8x128xf32>
    %55 = arith.select %35, %47, %54 : vector<8x128xi1>, vector<8x128xf32>
    %c0_25 = arith.constant 0 : index
    %c0_26 = arith.constant 0 : index
    %56 = vector.load %arg8[%c0_25, %c0_26] : memref<8x128xf32, #tpu.memory_space<vmem>>, vector<8x128xf32>
    tpu.vector_store %arg8[%c0_25, %c0_26], %55 {strides = array<i32>} : memref<8x128xf32, #tpu.memory_space<vmem>>, vector<8x128xf32>,
    return
  }
  func.func @transform_0(%arg0: i32) -> (i32, i32) {
    %c0_i32 = arith.constant 0 : i32
    %c0_i32_0 = arith.constant 0 : i32
    return %arg0, %c0_i32 : i32, i32
  }
  func.func @transform_1(%arg0: i32) -> (i32, i32) {
    %c0_i32 = arith.constant 0 : i32
    %c0_i32_0 = arith.constant 0 : i32
    %c0_i32_1 = arith.constant 0 : i32
    return %c0_i32, %c0_i32_0 : i32, i32
  }
  func.func @transform_2(%arg0: i32) -> (i32, i32) {
    %c0_i32 = arith.constant 0 : i32
    %c0_i32_0 = arith.constant 0 : i32
    %c0_i32_1 = arith.constant 0 : i32
    return %c0_i32, %c0_i32_0 : i32, i32
  }
  func.func @transform_3(%arg0: i32) -> (i32, i32) {
    %c0_i32 = arith.constant 0 : i32
    %c0_i32_0 = arith.constant 0 : i32
    %c0_i32_1 = arith.constant 0 : i32
    return %c0_i32, %c0_i32_0 : i32, i32
  }
  func.func @transform_4(%arg0: i32) -> (i32, i32) {
    %c0_i32 = arith.constant 0 : i32
    %c0_i32_0 = arith.constant 0 : i32
    %c0_i32_1 = arith.constant 0 : i32
    return %c0_i32, %c0_i32_0 : i32, i32
  }
  func.func @transform_5(%arg0: i32) -> (i32, i32) {
    %c0_i32 = arith.constant 0 : i32
    %c0_i32_0 = arith.constant 0 : i32
    %c0_i32_1 = arith.constant 0 : i32
    return %c0_i32, %c0_i32_0 : i32, i32
  }
  func.func @transform_6(%arg0: i32) -> (i32, i32) {
    %c0_i32 = arith.constant 0 : i32
    %c0_i32_0 = arith.constant 0 : i32
    %c0_i32_1 = arith.constant 0 : i32
    return %c0_i32, %c0_i32_0 : i32, i32
  }
  func.func @transform_7(%arg0: i32) -> (i32, i32) {
    %c0_i32 = arith.constant 0 : i32
    %c0_i32_0 = arith.constant 0 : i32
    return %arg0, %c0_i32 : i32, i32
  }
}

</mosaic_0001>

<bundles_post_ra>
// kernel: actor_forward.1
= control target key start
LH: loop header
LB: loop body
LE: loop exit
PB: predicated region body
PF: predicated region fallthrough
CT: control target
= control target key end

     0   :  { %12 = vsyncpa [#allocation3], 0  ;;  %s1096_s0 = inlined_call_operand.hbm [shape: f32[8,128], index: 0, kind: input, shape index: {}]   ;;  %s1097_s1 = inlined_call_operand.hbm [shape: bf16[128,256], index: 1, kind: input, shape index: {}]   ;;  %s1098_s2 = inlined_call_operand.vmem [shape: f32[1,256], index: 2, kind: input, shape index: {}]   ;;  %s1099_s3 = inlined_call_operand.hbm [shape: bf16[256,256], index: 3, kind: input, shape index: {}]   ;;  %s1100_s4 = inlined_call_operand.vmem [shape: f32[1,256], index: 4, kind: input, shape index: {}]   ;;  %s1101_s5 = inlined_call_operand.hbm [shape: bf16[256,128], index: 5, kind: input, shape index: {}]   ;;  %s1102_s6 = inlined_call_operand.vmem [shape: f32[1,128], index: 6, kind: input, shape index: {}]   ;;  %s1103_s7 = inlined_call_operand.vmem [shape: f32[8,128], index: 7, kind: output, shape index: {}]  }
   0x1   :  { %13 = vsyncpa [#allocation5], 0 }
   0x2   :  { %14 = vsyncpa [#allocation8], 0  ;;  %s973_s24 = smov [#allocation4]   ;;  %s879_s28 = scalar_lea.hbm %s1097_s1, 2048 }
   0x3   :  { %s30_s25 = sshll.u32 %s973_s24, 4  ;;  %p880_p0 = scmp.ne.s32.totalorder %s1097_s1, %s879_s28  ;;  %s31_s25 = int_to_ptr.vmem [resolvable:$true] %s30_s25 }
   0x4   :  { %p883_p1 = scmp.lt.u32.totalorder %s879_s28, %s1097_s1 }
   0x6   :  { %p885_p2 = pnand %p883_p1, %p880_p0 }
   0x8   :  { %888 = shalt.err (!%p885_p2)
}
   0x9   :  { %s889_s10 = scalar_lea.vmem %s31_s25, 2048  ;;  %p894_p4 = scmp.lt.s32.totalorder %s31_s25, %s31_s25 }
   0xa   :  { %p890_p3 = scmp.ne.s32.totalorder %s31_s25, %s889_s10  ;;  %p895_p5 = scmp.lt.s32.totalorder %s889_s10, %s889_s10 }
   0xc   :  { %p896_p6 = por %p895_p5, %p894_p4 }
   0xe   :  { %p897_p7 = pnand %p896_p6, %p890_p3 }
  0x10   :  { %900 = shalt.err (!%p897_p7)
}
  0x11   :  { %s974_s11 = smov 128   ;;  %s975_s12 = smov 8  }
  0x12   :  { %36 = dma.hbm_to_vmem [thread:$0]  %s1097_s1, 2048, %s31_s25, [#allocation5], %s974_s11, %s974_s11, %s975_s12  }
  0x13   :  { %s976_s15 = smov [#allocation2]   ;;  %s977_s17 = smov [#allocation6]  }
  0x14   :  { %s21_s16 = sshll.u32 %s976_s15, 4  ;;  %s44_s18 = sshll.u32 %s977_s17, 4  ;;  %s22_s16 = int_to_ptr.vmem [resolvable:$true] %s21_s16  ;;  %s45_s18 = int_to_ptr.vmem [resolvable:$true] %s44_s18 }
  0x15   :  { %s901_s21 = scalar_lea.hbm %s1096_s0, 128 }
  0x16   :  { %p902_p8 = scmp.ne.s32.totalorder %s1096_s0, %s901_s21  ;;  %p905_p9 = scmp.lt.u32.totalorder %s901_s21, %s1096_s0 }
  0x18   :  { %p907_p10 = pnand %p905_p9, %p902_p8 }
  0x1a   :  { %910 = shalt.err (!%p907_p10)
}
  0x1b   :  { %s911_s1 = scalar_lea.vmem %s22_s16, 128  ;;  %p916_p12 = scmp.lt.s32.totalorder %s22_s16, %s22_s16 }
  0x1c   :  { %p912_p11 = scmp.ne.s32.totalorder %s22_s16, %s911_s1  ;;  %p917_p13 = scmp.lt.s32.totalorder %s911_s1, %s911_s1 }
  0x1e   :  { %p918_p0 = por %p917_p13, %p916_p12 }
  0x20   :  { %p919_p1 = pnand %p918_p0, %p912_p11 }
  0x22   :  { %922 = shalt.err (!%p919_p1)
}
  0x23   :  { %24 = dma.hbm_to_vmem [thread:$0]  %s1096_s0, 128, %s22_s16, [#allocation3]  }
  0x24   :  { %s923_s30 = scalar_lea.hbm %s1099_s3, 4096 }
  0x25   :  { %p924_p2 = scmp.ne.s32.totalorder %s1099_s3, %s923_s30  ;;  %p927_p3 = scmp.lt.u32.totalorder %s923_s30, %s1099_s3 }
  0x27   :  { %p929_p4 = pnand %p927_p3, %p924_p2 }
  0x29   :  { %932 = shalt.err (!%p929_p4)
}
  0x2a   :  { %s933_s14 = scalar_lea.vmem %s45_s18, 4096  ;;  %p938_p6 = scmp.lt.s32.totalorder %s45_s18, %s45_s18 }
  0x2b   :  { %p934_p5 = scmp.ne.s32.totalorder %s45_s18, %s933_s14  ;;  %p939_p7 = scmp.lt.s32.totalorder %s933_s14, %s933_s14 }
  0x2d   :  { %p940_p8 = por %p939_p7, %p938_p6 }
  0x2f   :  { %p941_p9 = pnand %p940_p8, %p934_p5 }
  0x31   :  { %944 = shalt.err (!%p941_p9)
}
  0x32   :  { %50 = dma.hbm_to_vmem [thread:$0]  %s1099_s3, 4096, %s45_s18, [#allocation5], %s974_s11, %s974_s11, %s975_s12  }
  0x33   :  { %s978_s16 = smov [#allocation7]   ;;  %s945_s21 = scalar_lea.hbm %s1101_s5, 2048 }
  0x34   :  { %s58_s17 = sshll.u32 %s978_s16, 4  ;;  %p946_p10 = scmp.ne.s32.totalorder %s1101_s5, %s945_s21  ;;  %s59_s17 = int_to_ptr.vmem [resolvable:$true] %s58_s17 }
  0x35   :  { %p949_p11 = scmp.lt.u32.totalorder %s945_s21, %s1101_s5 }
  0x37   :  { %p951_p12 = pnand %p949_p11, %p946_p10 }
  0x39   :  { %954 = shalt.err (!%p951_p12)
}
  0x3a   :  { %s955_s1 = scalar_lea.vmem %s59_s17, 2048  ;;  %p960_p0 = scmp.lt.s32.totalorder %s59_s17, %s59_s17 }
  0x3b   :  { %p956_p13 = scmp.ne.s32.totalorder %s59_s17, %s955_s1  ;;  %p961_p1 = scmp.lt.s32.totalorder %s955_s1, %s955_s1 }
  0x3d   :  { %p962_p2 = por %p961_p1, %p960_p0 }
  0x3f   :  { %p963_p3 = pnand %p962_p2, %p956_p13 }
  0x41   :  { %966 = shalt.err (!%p963_p3)
}
  0x42   :  { %s979_s3 = smov 64   ;;  %s980_s11 = smov 4  }
  0x43   :  { %64 = dma.hbm_to_vmem [thread:$0]  %s1101_s5, 2048, %s59_s17, [#allocation8], %s979_s3, %s979_s3, %s980_s11  }
  0x44   :  { %967 = dma.done.wait [#allocation3], 128  }
  0x45   :  { %968 = vsyncadd [#allocation3], 4294967168 }
  0x46   :  { %969 = dma.done.wait [#allocation5], 6144  }
  0x47   :  { %970 = vsyncadd [#allocation5], 4294961152 }
  0x48   :  { %971 = dma.done.wait [#allocation8], 2048  }
  0x49   :  { %972 = vsyncadd [#allocation8], 4294965248  ;;  %v981_v0 = vmov 0   ;;  %v787_v1 = vld [vmem:[#allocation4 + $0x4] ss:$8 sps:$4 sm:$0xff]   ;;  %v80_v26 = vld [vmem:[#allocation2] sm:$0xff]  ;;  %v100_v63 = vlaneseq }
  0x4a   :  { %222 = vmatprep.mubr.bf16.mxu0 %v981_v0  ;;  %v789_v2 = vld [vmem:[#allocation4] ss:$8 sps:$4 sm:$0xff]   ;;  %190 = vmatprep.subr.bf16.mxu0 %v787_v1  ;;  %v790_v3 = vld [vmem:[#allocation4 + $0x14] ss:$8 sps:$4 sm:$0xff]   ;;  %v792_v4 = vld [vmem:[#allocation4 + $0x10] ss:$8 sps:$4 sm:$0xff]   ;;  %v81_v31 = vpack.c.bf16 %v80_v26, %v80_v26 }
  0x4b   :  { %191 = vmatpush1.bf16.msra.mxu0 %v789_v2  ;;  %v793_v5 = vld [vmem:[#allocation4 + $0x24] ss:$8 sps:$4 sm:$0xff]   ;;  %v795_v6 = vld [vmem:[#allocation4 + $0x20] ss:$8 sps:$4 sm:$0xff]   ;;  %v796_v7 = vld [vmem:[#allocation4 + $0x34] ss:$8 sps:$4 sm:$0xff]  }
  0x4c   :  { %192 = vmatprep.subr.bf16.mxu0 %v790_v3  ;;  %v798_v8 = vld [vmem:[#allocation4 + $0x30] ss:$8 sps:$4 sm:$0xff]   ;;  %v799_v9 = vld [vmem:[#allocation4 + $0x44] ss:$8 sps:$4 sm:$0xff]   ;;  %v813_v11 = vld [vmem:[#allocation6] ss:$8 sps:$4 sm:$0xff]  }
  0x4d   :  { %v811_v10 = vld [vmem:[#allocation6 + $0x4] ss:$8 sps:$4 sm:$0xff]   ;;  %v814_v12 = vld [vmem:[#allocation6 + $0x14] ss:$8 sps:$4 sm:$0xff]   ;;  %v801_v13 = vld [vmem:[#allocation4 + $0x40] ss:$8 sps:$4 sm:$0xff]  }
  0x4e   :  { %439 = vmatprep.subr.bf16.mxu1 %v811_v10  ;;  %v816_v14 = vld [vmem:[#allocation6 + $0x10] ss:$8 sps:$4 sm:$0xff]   ;;  %v817_v15 = vld [vmem:[#allocation6 + $0x24] ss:$8 sps:$4 sm:$0xff]   ;;  %v802_v16 = vld [vmem:[#allocation4 + $0x54] ss:$8 sps:$4 sm:$0xff]  }
  0x4f   :  { %193 = vmatpush1.bf16.msra.mxu0 %v792_v4  ;;  %440 = vmatpush1.bf16.msra.mxu1 %v813_v11  ;;  %v804_v17 = vld [vmem:[#allocation4 + $0x50] ss:$8 sps:$4 sm:$0xff]   ;;  %v819_v18 = vld [vmem:[#allocation6 + $0x20] ss:$8 sps:$4 sm:$0xff]   ;;  %v820_v19 = vld [vmem:[#allocation6 + $0x34] ss:$8 sps:$4 sm:$0xff]  }
  0x50   :  { %194 = vmatprep.subr.bf16.mxu0 %v793_v5  ;;  %441 = vmatprep.subr.bf16.mxu1 %v814_v12  ;;  %v805_v20 = vld [vmem:[#allocation4 + $0x64] ss:$8 sps:$4 sm:$0xff]   ;;  %v807_v21 = vld [vmem:[#allocation4 + $0x60] ss:$8 sps:$4 sm:$0xff]   ;;  %v822_v22 = vld [vmem:[#allocation6 + $0x30] ss:$8 sps:$4 sm:$0xff]  }
  0x51   :  { %v823_v23 = vld [vmem:[#allocation6 + $0x44] ss:$8 sps:$4 sm:$0xff]   ;;  %v808_v24 = vld [vmem:[#allocation4 + $0x74] ss:$8 sps:$4 sm:$0xff]   ;;  %v810_v25 = vld [vmem:[#allocation4 + $0x70] ss:$8 sps:$4 sm:$0xff]  }
  0x52   :  { %v825_v27 = vld [vmem:[#allocation6 + $0x40] ss:$8 sps:$4 sm:$0xff]   ;;  %v826_v28 = vld [vmem:[#allocation6 + $0x54] ss:$8 sps:$4 sm:$0xff]   ;;  %v828_v29 = vld [vmem:[#allocation6 + $0x50] ss:$8 sps:$4 sm:$0xff]  }
  0x53   :  { %195 = vmatpush1.bf16.msra.mxu0 %v795_v6  ;;  %442 = vmatpush1.bf16.msra.mxu1 %v816_v14  ;;  %v829_v30 = vld [vmem:[#allocation6 + $0x64] ss:$8 sps:$4 sm:$0xff]   ;;  %v831_v32 = vld [vmem:[#allocation6 + $0x60] ss:$8 sps:$4 sm:$0xff]   ;;  %v832_v33 = vld [vmem:[#allocation6 + $0x74] ss:$8 sps:$4 sm:$0xff]  }
  0x54   :  { %196 = vmatprep.subr.bf16.mxu0 %v796_v7  ;;  %443 = vmatprep.subr.bf16.mxu1 %v817_v15  ;;  %v834_v34 = vld [vmem:[#allocation6 + $0x70] ss:$8 sps:$4 sm:$0xff]   ;;  %v835_v35 = vld [vmem:[#allocation6 + $0x84] ss:$8 sps:$4 sm:$0xff]   ;;  %v837_v36 = vld [vmem:[#allocation6 + $0x80] ss:$8 sps:$4 sm:$0xff]  }
  0x55   :  { %v838_v37 = vld [vmem:[#allocation6 + $0x94] ss:$8 sps:$4 sm:$0xff]   ;;  %v840_v38 = vld [vmem:[#allocation6 + $0x90] ss:$8 sps:$4 sm:$0xff]   ;;  %v841_v39 = vld [vmem:[#allocation6 + $0xa4] ss:$8 sps:$4 sm:$0xff]  }
  0x56   :  { %v843_v40 = vld [vmem:[#allocation6 + $0xa0] ss:$8 sps:$4 sm:$0xff]   ;;  %v844_v41 = vld [vmem:[#allocation6 + $0xb4] ss:$8 sps:$4 sm:$0xff]   ;;  %v846_v42 = vld [vmem:[#allocation6 + $0xb0] ss:$8 sps:$4 sm:$0xff]  }
  0x57   :  { %197 = vmatpush1.bf16.msra.mxu0 %v798_v8  ;;  %444 = vmatpush1.bf16.msra.mxu1 %v819_v18  ;;  %v847_v43 = vld [vmem:[#allocation6 + $0xc4] ss:$8 sps:$4 sm:$0xff]   ;;  %v849_v44 = vld [vmem:[#allocation6 + $0xc0] ss:$8 sps:$4 sm:$0xff]   ;;  %v850_v45 = vld [vmem:[#allocation6 + $0xd4] ss:$8 sps:$4 sm:$0xff]  }
  0x58   :  { %198 = vmatprep.subr.bf16.mxu0 %v799_v9  ;;  %445 = vmatprep.subr.bf16.mxu1 %v820_v19  ;;  %v852_v46 = vld [vmem:[#allocation6 + $0xd0] ss:$8 sps:$4 sm:$0xff]   ;;  %v853_v47 = vld [vmem:[#allocation6 + $0xe4] ss:$8 sps:$4 sm:$0xff]   ;;  %v855_v48 = vld [vmem:[#allocation6 + $0xe0] ss:$8 sps:$4 sm:$0xff]  }
  0x59   :  { %v856_v49 = vld [vmem:[#allocation6 + $0xf4] ss:$8 sps:$4 sm:$0xff]   ;;  %v858_v50 = vld [vmem:[#allocation6 + $0xf0] ss:$8 sps:$4 sm:$0xff]   ;;  %v859_v51 = vld [vmem:[#allocation7 + $0x40] sm:$0xff]   ;;  %v101_v0 = vshrl.u32 %v100_v63, 7 }
  0x5a   :  { %v860_v52 = vld [vmem:[#allocation7] sm:$0xff]   ;;  %v861_v53 = vld [vmem:[#allocation7 + $0x48] sm:$0xff]   ;;  %v863_v55 = vld [vmem:[#allocation7 + $0x50] sm:$0xff]  }
  0x5b   :  { %199 = vmatpush1.bf16.msra.mxu0 %v801_v13  ;;  %446 = vmatpush1.bf16.msra.mxu1 %v822_v22  ;;  %v862_v54 = vld [vmem:[#allocation7 + $0x8] sm:$0xff]   ;;  %v864_v56 = vld [vmem:[#allocation7 + $0x10] sm:$0xff]   ;;  %v865_v57 = vld [vmem:[#allocation7 + $0x58] sm:$0xff]   ;;  %v102_v1 = vsub.s32 0, %v101_v0  ;;  %v106_v3 = vsub.s32 1, %v101_v0 }
  0x5c   :  { %200 = vmatprep.subr.bf16.mxu0 %v802_v16  ;;  %447 = vmatprep.subr.bf16.mxu1 %v823_v23  ;;  %v866_v58 = vld [vmem:[#allocation7 + $0x18] sm:$0xff]   ;;  %v867_v59 = vld [vmem:[#allocation7 + $0x60] sm:$0xff]   ;;  %v869_v61 = vld [vmem:[#allocation7 + $0x68] sm:$0xff]  }
  0x5d   :  { %v868_v60 = vld [vmem:[#allocation7 + $0x20] sm:$0xff]   ;;  %v870_v62 = vld [vmem:[#allocation7 + $0x28] sm:$0xff]   ;;  %v98_v2 = vld [vmem:[%s1098_s2] sm:$0x3] }
  0x5e   :  { %v103_v4 = vrot.slane %v98_v2, %v102_v1  ;;  %v107_v5 = vrot.slane %v98_v2, %v106_v3  ;;  %v871_v16 = vld [vmem:[#allocation7 + $0x70] sm:$0xff]   ;;  %v873_v18 = vld [vmem:[#allocation7 + $0x78] sm:$0xff]  }
  0x5f   :  { %201 = vmatpush1.bf16.msra.mxu0 %v804_v17  ;;  %448 = vmatpush1.bf16.msra.mxu1 %v825_v27  ;;  %v872_v17 = vld [vmem:[#allocation7 + $0x30] sm:$0xff]   ;;  %v874_v19 = vld [vmem:[#allocation7 + $0x38] sm:$0xff]  }
  0x60   :  { %202 = vmatprep.subr.bf16.mxu0 %v805_v20  ;;  %449 = vmatprep.subr.bf16.mxu1 %v826_v28  ;;  %v267_v20 = vld [vmem:[%s1100_s4] sm:$0x3] }
  0x61   :  { %v276_v22 = vrot.slane %v267_v20, %v106_v3 }
  0x63   :  { %203 = vmatpush1.bf16.msra.mxu0 %v807_v21  ;;  %450 = vmatpush1.bf16.msra.mxu1 %v828_v29  ;;  %v272_v21 = vrot.slane %v267_v20, %v102_v1 }
  0x64   :  { %204 = vmatprep.subr.bf16.mxu0 %v808_v24  ;;  %451 = vmatprep.subr.bf16.mxu1 %v829_v30 }
  0x67   :  { %205 = vmatpush1.bf16.msra.mxu0 %v810_v25  ;;  %452 = vmatpush1.bf16.msra.mxu1 %v831_v32 }
  0x68   :  { %453 = vmatprep.subr.bf16.mxu1 %v832_v33  ;;  %756 = vmatprep.subr.bf16.mxu0 %v859_v51  ;;  %v660_v33 = vand.u32 127, %v100_v63 }
  0x6a   :  { %223 = vmatmul.mubr.bf16.vlgmr.msra.gmra.mrb[0].mxu0 %v81_v31  ;;  %vm665_vm0 = vcmp.ge.s32.totalorder %v660_v33, 8  ;;  %vm666_vm1 = vcmp.lt.s32.totalorder %v660_v33, 11  ;;  %vm661_vm2 = vcmp.lt.s32.totalorder %v660_v33, 4  ;;  %vm662_vm4 = vcmp.ge.s32.totalorder %v660_v33, 4 }
  0x6b   :  { %454 = vmatpush1.bf16.msra.mxu1 %v834_v34  ;;  %757 = vmatpush3.bf16.msra.mxu0 %v860_v52  ;;  %vm1085_vm3 = vmand %vm665_vm0, %vm666_vm1  ;;  %vm663_vm5 = vcmp.lt.s32.totalorder %v660_v33, 8 }
  0x6c   :  { %455 = vmatprep.subr.bf16.mxu1 %v835_v35  ;;  %758 = vmatprep.subr.bf16.mxu0 %v861_v53  ;;  %v739_v35 = vld [vmem:[%s1102_s6] ss:$0 sm:$0xff]  ;;  %vm664_vm6 = vmand %vm662_vm4, %vm663_vm5 }
  0x6f   :  { %456 = vmatpush1.bf16.msra.mxu1 %v837_v36  ;;  %759 = vmatpush3.bf16.msra.mxu0 %v862_v54 }
  0x70   :  { %457 = vmatprep.subr.bf16.mxu1 %v838_v37  ;;  %760 = vmatprep.subr.bf16.mxu0 %v863_v55 }
  0x73   :  { %458 = vmatpush1.bf16.msra.mxu1 %v840_v38  ;;  %761 = vmatpush3.bf16.msra.mxu0 %v864_v56 }
  0x74   :  { %459 = vmatprep.subr.bf16.mxu1 %v841_v39  ;;  %762 = vmatprep.subr.bf16.mxu0 %v865_v57 }
  0x77   :  { %460 = vmatpush1.bf16.msra.mxu1 %v843_v40  ;;  %763 = vmatpush3.bf16.msra.mxu0 %v866_v58 }
  0x78   :  { %461 = vmatprep.subr.bf16.mxu1 %v844_v41  ;;  %764 = vmatprep.subr.bf16.mxu0 %v867_v59 }
  0x7b   :  { %462 = vmatpush1.bf16.msra.mxu1 %v846_v42  ;;  %765 = vmatpush3.bf16.msra.mxu0 %v868_v60 }
  0x7c   :  { %463 = vmatprep.subr.bf16.mxu1 %v847_v43  ;;  %766 = vmatprep.subr.bf16.mxu0 %v869_v61 }
  0x7f   :  { %464 = vmatpush1.bf16.msra.mxu1 %v849_v44  ;;  %767 = vmatpush3.bf16.msra.mxu0 %v870_v62 }
  0x80   :  { %465 = vmatprep.subr.bf16.mxu1 %v850_v45  ;;  %768 = vmatprep.subr.bf16.mxu0 %v871_v16 }
  0x83   :  { %466 = vmatpush1.bf16.msra.mxu1 %v852_v46  ;;  %769 = vmatpush3.bf16.msra.mxu0 %v872_v17 }
  0x84   :  { %467 = vmatprep.subr.bf16.mxu1 %v853_v47  ;;  %770 = vmatprep.subr.bf16.mxu0 %v873_v18 }
  0x87   :  { %468 = vmatpush1.bf16.msra.mxu1 %v855_v48  ;;  %771 = vmatpush3.bf16.msra.mxu0 %v874_v19 }
  0x88   :  { %469 = vmatprep.subr.bf16.mxu1 %v856_v49 }
  0x8b   :  { %470 = vmatpush1.bf16.msra.mxu1 %v858_v50 }
 0x13d   :  { %v224_v6 = vpop.f32.mrb[0].mxu0 }
 0x13e   :  { %v225_v7 = vadd.f32 %v224_v6, %v103_v4  ;;  %v226_v8 = vpop.f32.mrb[1].mxu0 }
 0x13f   :  { %v227_v9 = vadd.f32 %v226_v8, %v107_v5  ;;  %v228_v10 = vpop.f32.mrb[2].mxu0 }
 0x140   :  { %v231_v11 = vmax.f32 %v225_v7, 0.0  ;;  %v229_v12 = vpop.f32.mrb[3].mxu0 }
 0x141   :  { %v232_v13 = vmax.f32 %v227_v9, 0.0 }
 0x142   :  { %v233_v15 = vpack.c.bf16 %v231_v11, %v231_v11 }
 0x143   :  { %v234_v14 = vpack.c.bf16 %v232_v13, %v232_v13 }
 0x145   :  { %471 = vmatprep.mubr.bf16.mxu1 %v234_v14 }
 0x146   :  { %472 = vmatmul.mubr.bf16.vlgmr.msra.gmra.mrb[0].mxu1 %v233_v15 }
 0x219   :  { %v473_v23 = vpop.f32.mrb[0].mxu1 }
 0x21a   :  { %v474_v24 = vadd.f32 %v473_v23, %v272_v21  ;;  %v475_v25 = vpop.f32.mrb[1].mxu1 }
 0x21b   :  { %v476_v26 = vadd.f32 %v475_v25, %v276_v22  ;;  %v477_v27 = vpop.f32.mrb[2].mxu1 }
 0x21c   :  { %v480_v28 = vmax.f32 %v474_v24, 0.0  ;;  %v478_v29 = vpop.f32.mrb[3].mxu1 }
 0x21d   :  { %v481_v30 = vmax.f32 %v476_v26, 0.0 }
 0x21e   :  { %v482_v32 = vpack.c.bf16 %v480_v28, %v480_v28 }
 0x21f   :  { %v483_v31 = vpack.c.bf16 %v481_v30, %v481_v30 }
 0x221   :  { %651 = vmatprep.mubr.bf16.mxu0 %v483_v31 }
 0x222   :  { %652 = vmatmul.mubr.bf16.vlgmr.msra.gmra.mrb[4].mxu0 %v482_v32 }
 0x2f5   :  { %v772_v34 = vpop.f32.mrb[4].mxu0 }
 0x2f6   :  { %v773_v36 = vpop.f32.mrb[5].mxu0 }
 0x2f7   :  { %v774_v37 = vadd.f32 %v773_v36, %v772_v34  ;;  %v775_v38 = vpop.f32.mrb[6].mxu0 }
 0x2f8   :  { %v776_v39 = vpop.f32.mrb[7].mxu0 }
 0x2f9   :  { %v654_v41 = vadd.f32 %v774_v37, %v739_v35 }
 0x2fb   :  { %v678_v42 = vsel %vm661_vm2, %v654_v41, 0.0  ;;  %v679_v43 = vmax.f32 %v654_v41, 1e-06  ;;  %v668_v44 = vsel %vm1085_vm3, %v654_v41, -1e+30 }
 0x2fc   :  { %669 = vmax.xlane.f32.xlu0 %v668_v44 }
 0x2fd   :  { %v680_v45 = vmin.f32 %v679_v43, 1.0 }
 0x2ff   :  { %v681_v46 = vsel %vm664_vm6, %v680_v45, %v678_v42 }
 0x389   :  { %v670_v47 = vpop.xlane.xlu0 %669 }
 0x38a   :  { %v671_v48 = vsub.f32 %v668_v44, %v670_v47 }
 0x38c   :  { %v672_v49 = vmul.f32 1.442695, %v671_v48 }
 0x38e   :  { %875 = vpow2.f32 %v672_v49 }
 0x398   :  { %v876_v50 = vpop.eup %875 }
 0x399   :  { %674 = vadd.xlane.f32.xlu0 %v876_v50 }
 0x426   :  { %v675_v51 = vpop.xlane.xlu0 %674 }
 0x427   :  { %877 = vrcp.f32 %v675_v51 }
 0x431   :  { %v878_v52 = vpop.eup %877 }
 0x432   :  { %v677_v53 = vmul.f32 %v878_v52, %v876_v50 }
 0x434   :  { %v682_v54 = vsel %vm1085_vm3, %v677_v53, %v681_v46 }
 0x435   :  { %683 = vst [vmem:[%s1103_s7] sm:$0xff] %v682_v54 }
 0x436   :  { %688 = vsyncpa [#allocation3], 1 }
 0x437   :  { %689 = vsyncpa [#allocation5], 1 }
 0x438   :  { %690 = vsyncpa [#allocation8], 1 }

</bundles_post_ra>
